<compile_context>
chip_gen: v7x
topology: tpu7x:2x2x1
jax: 0.10.0
libtpu: 0.0.40
codegen_flags: <defaults>
</compile_context>

<pallas_src>
import functools

import jax
import jax.numpy as jnp
from jax.experimental import pallas as pl
from jax.experimental.pallas import tpu as pltpu


# ----------------------------------------------------------------------------
# Kernel
# ----------------------------------------------------------------------------
def _coupling_kernel(n_layers, hidden, x_ref, mask_ref, *refs):
    """Feature-major fused coupling layer.

    refs = [W0, b0, W1, b1, ..., W_{L-1}, b_{L-1}, u_ref, ld_ref]

    Shapes (TB = batch tile on the lane axis):
      x_ref    : (D, TB)  f32
      mask_ref : (D, 1)   f32
      W0       : (2H, D)  bf16   -- s/t layer-0 weights stacked vertically
      Wi, i>0  : blockdiag(sWi, tWi) bf16   (middle: (2H,2H), last: (2D,2H))
      bi       : (rows,1) f32
      u_ref    : (D, TB)  f32
      ld_ref   : (D, TB)  f32
    """
    u_ref = refs[2 * n_layers]
    ld_ref = refs[2 * n_layers + 1]

    x = x_ref[...]                         # (D, TB) f32
    mask = mask_ref[...]                   # (D, 1)  f32, broadcasts over lanes
    mx = x * mask

    # Fused layer 0: one MXU matmul feeds both towers (bf16 in, f32 acc).
    w0 = refs[0][...]
    h = jnp.dot(w0, mx.astype(w0.dtype),
                preferred_element_type=jnp.float32) + refs[1][...]   # (2H, TB)

    # Mixed activation: rows < H belong to the s-tower (Tanh), rows >= H to the
    # t-tower (ReLU).  Every non-first Linear consumes a (2H, TB) tensor, so one
    # sublane-index mask serves all activation applications.
    row = jax.lax.broadcasted_iota(jnp.int32, h.shape, 0)
    is_s_row = row < hidden

    for li in range(1, n_layers):
        a = jnp.where(is_s_row, jnp.tanh(h), jnp.maximum(h, 0.0))    # f32
        w = refs[2 * li][...]
        h = jnp.dot(w, a.astype(w.dtype),
                    preferred_element_type=jnp.float32) + refs[2 * li + 1][...]

    d = x.shape[0]
    s = h[:d, :]                           # (D, TB)
    t = h[d:, :]                           # (D, TB)
    one_minus_mask = 1.0 - mask
    u_ref[...] = mx + one_minus_mask * (x - t) * jnp.exp(-s)
    ld_ref[...] = -one_minus_mask * s


# ----------------------------------------------------------------------------
# Wrapper-side parameter packing (stack layer 0, block-diagonal for the rest)
# ----------------------------------------------------------------------------
def _pack_params(s_params, t_params, weight_dtype=jnp.bfloat16):
    """s_params / t_params are flat [W0, b0, W1, b1, ...] with W stored
    (in_features, out_features) (the `x @ W` convention)."""
    n_layers = len(s_params) // 2
    packed = []
    for li in range(n_layers):
        sw = s_params[2 * li].T                        # (out, in)
        tw = t_params[2 * li].T
        sb = s_params[2 * li + 1].reshape(-1, 1)       # (out, 1)
        tb_ = t_params[2 * li + 1].reshape(-1, 1)
        if li == 0:
            w = jnp.concatenate([sw, tw], axis=0)      # (2H, D)
        else:
            o_s, i_s = sw.shape
            o_t, i_t = tw.shape
            w = jnp.concatenate(
                [jnp.concatenate([sw, jnp.zeros((o_s, i_t), sw.dtype)], axis=1),
                 jnp.concatenate([jnp.zeros((o_t, i_s), tw.dtype), tw], axis=1)],
                axis=0)                                # blockdiag(sw, tw)
        packed.append(w.astype(weight_dtype))
        packed.append(jnp.concatenate([sb, tb_], axis=0).astype(jnp.float32))
    return packed


# ----------------------------------------------------------------------------
# Wrapper
# ----------------------------------------------------------------------------
def linear_masked_coupling_forward(x, mask, s_params, t_params, *, tb=None):
    """x: (B, D) f32; mask: any shape of size D; *_params: flat [W0, b0, ...]
    with W in (in, out) layout.  Returns (u, log_abs_det_jacobian), each (B, D)."""
    B, D = x.shape
    n_layers = len(s_params) // 2
    assert n_layers >= 2, "s_net always has at least two Linear layers"
    H = s_params[0].shape[1]

    # Feature-major: put the batch on the 128-wide lane axis.
    x_t = x.T                                             # (D, B)
    mask_col = mask.reshape(-1, 1).astype(jnp.float32)    # (D, 1)
    packed = _pack_params(s_params, t_params)             # bf16 weights, f32 biases

    # Batch tile: multiple of 128 (lane width), prefer >= 2 grid steps so both
    # v7x TensorCores get work, cap at 512 to keep activations in vregs.
    if tb is None:
        tb = max(128, min(512, ((B // 2) // 128) * 128))
    else:
        tb = max(128, (tb // 128) * 128)
    if B < tb:
        tb = B                     # tiny-batch fallback: one full-array block
    grid = (pl.cdiv(B, tb),)       # no zero-padding pass; ragged last tile OK

    # VMEM budget: double-buffered x/u/ld tiles + resident params (+ headroom),
    # capped well below v7x's 64 MiB physical per-core VMEM.
    io_bytes = 2 * 3 * tb * D * 4
    param_bytes = sum(int(p.size) * p.dtype.itemsize for p in packed)
    param_bytes += int(mask_col.size) * 4
    vmem_limit = int(min(48 * 2 ** 20,
                         max(16 * 2 ** 20, 4 * (io_bytes + 2 * param_bytes))))

    # Advisory cost estimate for the XLA scheduler.
    mm_flops = sum(2 * B * int(packed[2 * i].shape[0]) * int(packed[2 * i].shape[1])
                   for i in range(n_layers))
    cost = pl.CostEstimate(
        flops=int(mm_flops + 10 * B * D),
        transcendentals=int(B * 2 * H * (n_layers - 1) + B * D),
        bytes_accessed=int(3 * B * D * 4 + param_bytes),
    )

    kernel = functools.partial(_coupling_kernel, n_layers, H)

    # Weights / biases / mask: constant index_map -> DMA'd once, VMEM-resident.
    param_specs = [pl.BlockSpec(p.shape, lambda i: (0, 0)) for p in packed]

    u_t, ld_t = pl.pallas_call(
        kernel,
        out_shape=(jax.ShapeDtypeStruct((D, B), jnp.float32),
                   jax.ShapeDtypeStruct((D, B), jnp.float32)),
        grid=grid,
        in_specs=[pl.BlockSpec((D, tb), lambda i: (0, i)),          # x^T, batch-tiled
                  pl.BlockSpec(mask_col.shape, lambda i: (0, 0))]   # mask column
                 + param_specs,
        out_specs=(pl.BlockSpec((D, tb), lambda i: (0, i)),         # u^T
                   pl.BlockSpec((D, tb), lambda i: (0, i))),        # logdet^T
        compiler_params=pltpu.CompilerParams(
            dimension_semantics=("parallel",),                      # megacore on v7x
            vmem_limit_bytes=vmem_limit),
        cost_estimate=cost,
    )(x_t, mask_col, *packed)

    return u_t.T, ld_t.T


# ----------------------------------------------------------------------------
# Deterministic parameter construction (mimics nn.Linear's uniform init ranges)
# ----------------------------------------------------------------------------
def _init_mlp_params(key, dims):
    """dims = [in, hidden, ..., out]; returns flat [W0, b0, ...] with W (in, out)."""
    params = []
    for i in range(len(dims) - 1):
        fan_in, fan_out = dims[i], dims[i + 1]
        key, kw, kb = jax.random.split(key, 3)
        bound = 1.0 / (fan_in ** 0.5)
        w = jax.random.uniform(kw, (fan_in, fan_out), jnp.float32, -bound, bound)
        b = jax.random.uniform(kb, (1, fan_out), jnp.float32, -bound, bound)
        params += [w, b]
    return params, key


# ----------------------------------------------------------------------------
# Pure-JAX reference (mirrors the PyTorch forward exactly; batch-major)
# ----------------------------------------------------------------------------
def _reference_forward(x, mask, s_params, t_params, matmul_dtype=jnp.float32):
    n_layers = len(s_params) // 2
    mx = x * mask

    def tower(params, act):
        h = mx
        for li in range(n_layers):
            if li > 0:
                h = act(h)
            w = params[2 * li].astype(matmul_dtype)
            h = jnp.dot(h.astype(matmul_dtype), w,
                        preferred_element_type=jnp.float32) + params[2 * li + 1]
        return h

    s = tower(s_params, jnp.tanh)
    t = tower(t_params, lambda v: jnp.maximum(v, 0.0))
    u = mx + (1.0 - mask) * (x - t) * jnp.exp(-s)
    return u, -(1.0 - mask) * s


# ----------------------------------------------------------------------------
if __name__ == "__main__":
    # Small MAF-style shapes: input_size=8, hidden_size=32, n_hidden=1, batch=256
    # (two 128-wide batch tiles -> exercises the pipeline and the megacore split).
    input_size = 8
    hidden_size = 32
    n_hidden = 1
    batch = 256

    key = jax.random.PRNGKey(0)
    key, kx = jax.random.split(key)
    x = jax.random.normal(kx, (batch, input_size), jnp.float32)

    # Alternating binary mask, as typically used with this coupling layer.
    mask = (jnp.arange(input_size) % 2).astype(jnp.float32).reshape(1, input_size)

    dims = [input_size] + [hidden_size] * (n_hidden + 1) + [input_size]
    s_params, key = _init_mlp_params(key, dims)
    t_params, key = _init_mlp_params(key, dims)

    u, logdet = linear_masked_coupling_forward(x, mask, s_params, t_params)
    u = jax.block_until_ready(u)
    logdet = jax.block_until_ready(logdet)

    # Tight check vs a reference using the same bf16 matmul inputs (f32 acc).
    u_rb, ld_rb = _reference_forward(x, mask, s_params, t_params,
                                     matmul_dtype=jnp.bfloat16)
    assert jnp.allclose(u, u_rb, atol=2e-3, rtol=2e-3), "u mismatch (bf16 ref)"
    assert jnp.allclose(logdet, ld_rb, atol=2e-3, rtol=2e-3), "logdet mismatch (bf16 ref)"

    # Loose check vs the full-f32 reference (bf16 MXU rounding is ~1e-2 absolute).
    u_rf, ld_rf = _reference_forward(x, mask, s_params, t_params)
    assert jnp.allclose(u, u_rf, atol=7e-2, rtol=7e-2), "u mismatch (f32 ref)"
    assert jnp.allclose(logdet, ld_rf, atol=7e-2, rtol=7e-2), "logdet mismatch (f32 ref)"

    print("KERNEL_OK")
</pallas_src>

<mosaic_0001>
module attributes {stable_mosaic.version = 11 : i64} {
  func.func @_coupling_kernel(%arg0: i32, %arg1: memref<8x128xf32, #tpu.memory_space<vmem>>, %arg2: memref<8x1xf32, #tpu.memory_space<vmem>>, %arg3: memref<64x8xbf16, #tpu.memory_space<vmem>>, %arg4: memref<64x1xf32, #tpu.memory_space<vmem>>, %arg5: memref<64x64xbf16, #tpu.memory_space<vmem>>, %arg6: memref<64x1xf32, #tpu.memory_space<vmem>>, %arg7: memref<16x64xbf16, #tpu.memory_space<vmem>>, %arg8: memref<16x1xf32, #tpu.memory_space<vmem>>, %arg9: memref<8x128xf32, #tpu.memory_space<vmem>>, %arg10: memref<8x128xf32, #tpu.memory_space<vmem>>) attributes {dimension_semantics = [#tpu.dimension_semantics<parallel>], iteration_bounds = array<i64: 2>, scalar_prefetch = 0 : i64, scratch_operands = 0 : i64, tpu.core_type = #tpu.core_type<tc>, window_params = [{transform_indices = @transform_0, window_bounds = array<i64: 8, 128>}, {pipeline_mode = #tpu.pipeline_mode<synchronous>, transform_indices = @transform_1, window_bounds = array<i64: 8, 1>}, {pipeline_mode = #tpu.pipeline_mode<synchronous>, transform_indices = @transform_2, window_bounds = array<i64: 64, 8>}, {pipeline_mode = #tpu.pipeline_mode<synchronous>, transform_indices = @transform_3, window_bounds = array<i64: 64, 1>}, {pipeline_mode = #tpu.pipeline_mode<synchronous>, transform_indices = @transform_4, window_bounds = array<i64: 64, 64>}, {pipeline_mode = #tpu.pipeline_mode<synchronous>, transform_indices = @transform_5, window_bounds = array<i64: 64, 1>}, {pipeline_mode = #tpu.pipeline_mode<synchronous>, transform_indices = @transform_6, window_bounds = array<i64: 16, 64>}, {pipeline_mode = #tpu.pipeline_mode<synchronous>, transform_indices = @transform_7, window_bounds = array<i64: 16, 1>}, {transform_indices = @transform_8, window_bounds = array<i64: 8, 128>}, {transform_indices = @transform_9, window_bounds = array<i64: 8, 128>}]} {
    %c0 = arith.constant 0 : index
    %c0_0 = arith.constant 0 : index
    %0 = vector.load %arg1[%c0, %c0_0] : memref<8x128xf32, #tpu.memory_space<vmem>>, vector<8x128xf32>
    %c0_1 = arith.constant 0 : index
    %c0_2 = arith.constant 0 : index
    %1 = vector.load %arg2[%c0_1, %c0_2] : memref<8x1xf32, #tpu.memory_space<vmem>>, vector<8x1xf32>
    %2 = vector.broadcast %1 : vector<8x1xf32> to vector<8x128xf32>
    %3 = arith.mulf %0, %2 : vector<8x128xf32>
    %c0_3 = arith.constant 0 : index
    %c0_4 = arith.constant 0 : index
    %4 = vector.load %arg3[%c0_3, %c0_4] : memref<64x8xbf16, #tpu.memory_space<vmem>>, vector<64x8xbf16>
    %5 = arith.truncf %3 : vector<8x128xf32> to vector<8x128xbf16>
    %cst = arith.constant dense<0.000000e+00> : vector<64x128xf32>
    %6 = tpu.matmul %4, %5, %cst {dimension_numbers = #tpu.dot_dimension_numbers<[1], [0], [0], [1], [0, 0, 1, 1], [], []>} : vector<64x8xbf16>, vector<8x128xbf16>, vector<64x128xf32> -> vector<64x128xf32>
    %c0_5 = arith.constant 0 : index
    %c0_6 = arith.constant 0 : index
    %7 = vector.load %arg4[%c0_5, %c0_6] : memref<64x1xf32, #tpu.memory_space<vmem>>, vector<64x1xf32>
    %8 = vector.broadcast %7 : vector<64x1xf32> to vector<64x128xf32>
    %9 = arith.addf %6, %8 : vector<64x128xf32>
    %10 = tpu.iota {dimensions = array<i32: 0>} : vector<64x128xi32>
    %c32_i32 = arith.constant 32 : i32
    %11 = vector.broadcast %c32_i32 : i32 to vector<64x128xi32>
    %12 = arith.cmpi slt, %10, %11 : vector<64x128xi32>
    %13 = math.tanh %9 : vector<64x128xf32>
    %cst_7 = arith.constant 0.000000e+00 : f32
    %14 = vector.broadcast %cst_7 : f32 to vector<64x128xf32>
    %15 = arith.maximumf %9, %14 : vector<64x128xf32>
    %16 = arith.select %12, %13, %15 : vector<64x128xi1>, vector<64x128xf32>
    %c0_8 = arith.constant 0 : index
    %c0_9 = arith.constant 0 : index
    %17 = vector.load %arg5[%c0_8, %c0_9] : memref<64x64xbf16, #tpu.memory_space<vmem>>, vector<64x64xbf16>
    %18 = arith.truncf %16 : vector<64x128xf32> to vector<64x128xbf16>
    %cst_10 = arith.constant dense<0.000000e+00> : vector<64x128xf32>
    %19 = tpu.matmul %17, %18, %cst_10 {dimension_numbers = #tpu.dot_dimension_numbers<[1], [0], [0], [1], [0, 0, 1, 1], [], []>} : vector<64x64xbf16>, vector<64x128xbf16>, vector<64x128xf32> -> vector<64x128xf32>
    %c0_11 = arith.constant 0 : index
    %c0_12 = arith.constant 0 : index
    %20 = vector.load %arg6[%c0_11, %c0_12] : memref<64x1xf32, #tpu.memory_space<vmem>>, vector<64x1xf32>
    %21 = vector.broadcast %20 : vector<64x1xf32> to vector<64x128xf32>
    %22 = arith.addf %19, %21 : vector<64x128xf32>
    %23 = math.tanh %22 : vector<64x128xf32>
    %cst_13 = arith.constant 0.000000e+00 : f32
    %24 = vector.broadcast %cst_13 : f32 to vector<64x128xf32>
    %25 = arith.maximumf %22, %24 : vector<64x128xf32>
    %26 = arith.select %12, %23, %25 : vector<64x128xi1>, vector<64x128xf32>
    %c0_14 = arith.constant 0 : index
    %c0_15 = arith.constant 0 : index
    %27 = vector.load %arg7[%c0_14, %c0_15] : memref<16x64xbf16, #tpu.memory_space<vmem>>, vector<16x64xbf16>
    %28 = arith.truncf %26 : vector<64x128xf32> to vector<64x128xbf16>
    %cst_16 = arith.constant dense<0.000000e+00> : vector<16x128xf32>
    %29 = tpu.matmul %27, %28, %cst_16 {dimension_numbers = #tpu.dot_dimension_numbers<[1], [0], [0], [1], [0, 0, 1, 1], [], []>} : vector<16x64xbf16>, vector<64x128xbf16>, vector<16x128xf32> -> vector<16x128xf32>
    %c0_17 = arith.constant 0 : index
    %c0_18 = arith.constant 0 : index
    %30 = vector.load %arg8[%c0_17, %c0_18] : memref<16x1xf32, #tpu.memory_space<vmem>>, vector<16x1xf32>
    %31 = vector.broadcast %30 : vector<16x1xf32> to vector<16x128xf32>
    %32 = arith.addf %29, %31 : vector<16x128xf32>
    %33 = vector.extract_strided_slice %32 {offsets = [0, 0], sizes = [8, 128], strides = [1, 1]} : vector<16x128xf32> to vector<8x128xf32>
    %34 = vector.extract_strided_slice %32 {offsets = [8, 0], sizes = [8, 128], strides = [1, 1]} : vector<16x128xf32> to vector<8x128xf32>
    %cst_19 = arith.constant 1.000000e+00 : f32
    %35 = vector.broadcast %cst_19 : f32 to vector<8x1xf32>
    %36 = arith.subf %35, %1 : vector<8x1xf32>
    %37 = arith.subf %0, %34 : vector<8x128xf32>
    %38 = vector.broadcast %36 : vector<8x1xf32> to vector<8x128xf32>
    %39 = arith.mulf %38, %37 : vector<8x128xf32>
    %cst_20 = arith.constant 0.000000e+00 : f32
    %40 = vector.broadcast %cst_20 : f32 to vector<8x128xf32>
    %41 = arith.subf %40, %33 : vector<8x128xf32>
    %42 = math.exp %41 : vector<8x128xf32>
    %43 = arith.mulf %39, %42 : vector<8x128xf32>
    %44 = arith.addf %3, %43 : vector<8x128xf32>
    %c0_21 = arith.constant 0 : index
    %c0_22 = arith.constant 0 : index
    %45 = vector.load %arg9[%c0_21, %c0_22] : memref<8x128xf32, #tpu.memory_space<vmem>>, vector<8x128xf32>
    tpu.vector_store %arg9[%c0_21, %c0_22], %44 {strides = array<i32>} : memref<8x128xf32, #tpu.memory_space<vmem>>, vector<8x128xf32>,
    %cst_23 = arith.constant 0.000000e+00 : f32
    %46 = vector.broadcast %cst_23 : f32 to vector<8x1xf32>
    %47 = arith.subf %46, %36 : vector<8x1xf32>
    %48 = vector.broadcast %47 : vector<8x1xf32> to vector<8x128xf32>
    %49 = arith.mulf %48, %33 : vector<8x128xf32>
    %c0_24 = arith.constant 0 : index
    %c0_25 = arith.constant 0 : index
    %50 = vector.load %arg10[%c0_24, %c0_25] : memref<8x128xf32, #tpu.memory_space<vmem>>, vector<8x128xf32>
    tpu.vector_store %arg10[%c0_24, %c0_25], %49 {strides = array<i32>} : memref<8x128xf32, #tpu.memory_space<vmem>>, vector<8x128xf32>,
    return
  }
  func.func @transform_0(%arg0: i32) -> (i32, i32) {
    %c0_i32 = arith.constant 0 : i32
    %c0_i32_0 = arith.constant 0 : i32
    return %c0_i32, %arg0 : i32, i32
  }
  func.func @transform_1(%arg0: i32) -> (i32, i32) {
    %c0_i32 = arith.constant 0 : i32
    %c0_i32_0 = arith.constant 0 : i32
    %c0_i32_1 = arith.constant 0 : i32
    return %c0_i32, %c0_i32_0 : i32, i32
  }
  func.func @transform_2(%arg0: i32) -> (i32, i32) {
    %c0_i32 = arith.constant 0 : i32
    %c0_i32_0 = arith.constant 0 : i32
    %c0_i32_1 = arith.constant 0 : i32
    return %c0_i32, %c0_i32_0 : i32, i32
  }
  func.func @transform_3(%arg0: i32) -> (i32, i32) {
    %c0_i32 = arith.constant 0 : i32
    %c0_i32_0 = arith.constant 0 : i32
    %c0_i32_1 = arith.constant 0 : i32
    return %c0_i32, %c0_i32_0 : i32, i32
  }
  func.func @transform_4(%arg0: i32) -> (i32, i32) {
    %c0_i32 = arith.constant 0 : i32
    %c0_i32_0 = arith.constant 0 : i32
    %c0_i32_1 = arith.constant 0 : i32
    return %c0_i32, %c0_i32_0 : i32, i32
  }
  func.func @transform_5(%arg0: i32) -> (i32, i32) {
    %c0_i32 = arith.constant 0 : i32
    %c0_i32_0 = arith.constant 0 : i32
    %c0_i32_1 = arith.constant 0 : i32
    return %c0_i32, %c0_i32_0 : i32, i32
  }
  func.func @transform_6(%arg0: i32) -> (i32, i32) {
    %c0_i32 = arith.constant 0 : i32
    %c0_i32_0 = arith.constant 0 : i32
    %c0_i32_1 = arith.constant 0 : i32
    return %c0_i32, %c0_i32_0 : i32, i32
  }
  func.func @transform_7(%arg0: i32) -> (i32, i32) {
    %c0_i32 = arith.constant 0 : i32
    %c0_i32_0 = arith.constant 0 : i32
    %c0_i32_1 = arith.constant 0 : i32
    return %c0_i32, %c0_i32_0 : i32, i32
  }
  func.func @transform_8(%arg0: i32) -> (i32, i32) {
    %c0_i32 = arith.constant 0 : i32
    %c0_i32_0 = arith.constant 0 : i32
    return %c0_i32, %arg0 : i32, i32
  }
  func.func @transform_9(%arg0: i32) -> (i32, i32) {
    %c0_i32 = arith.constant 0 : i32
    %c0_i32_0 = arith.constant 0 : i32
    return %c0_i32, %arg0 : i32, i32
  }
}

</mosaic_0001>

<bundles_post_ra>
// kernel: tpu_custom_call.1
= control target key start
LH: loop header
LB: loop body
LE: loop exit
PB: predicated region body
PF: predicated region fallthrough
CT: control target
= control target key end

     0   :  { %15 = vsyncpa [#allocation3], 0  ;;  %s1500_s0 = inlined_call_operand.vmem [shape: f32[8,256], index: 0, kind: input, shape index: {}]   ;;  %s1501_s1 = inlined_call_operand.vmem [shape: f32[8,1], index: 1, kind: input, shape index: {}]   ;;  %s1502_s2 = inlined_call_operand.vmem [shape: bf16[64,8], index: 2, kind: input, shape index: {}]   ;;  %s1503_s3 = inlined_call_operand.vmem [shape: f32[64,1], index: 3, kind: input, shape index: {}]   ;;  %s1504_s4 = inlined_call_operand.vmem [shape: bf16[64,64], index: 4, kind: input, shape index: {}]   ;;  %s1505_s5 = inlined_call_operand.vmem [shape: f32[64,1], index: 5, kind: input, shape index: {}]   ;;  %s1506_s6 = inlined_call_operand.vmem [shape: bf16[16,64], index: 6, kind: input, shape index: {}]   ;;  %s1507_s7 = inlined_call_operand.vmem [shape: f32[16,1], index: 7, kind: input, shape index: {}]   ;;  %s1508_s8 = inlined_call_operand.hbm [shape: f32[8,256], index: 8, kind: output, shape index: {0}]   ;;  %s1509_s9 = inlined_call_operand.hbm [shape: f32[8,256], index: 9, kind: output, shape index: {1}]  }
   0x1   :  { %17 = vsyncpa [#allocation3 + $0x1], 0 }
   0x2   :  { %18 = vsyncpa [#allocation5], 0 }
   0x3   :  { %20 = vsyncpa [#allocation5 + $0x1], 0  ;;  %s1257_s30 = smov 0   ;;  %s1259_s10 = smov 0  }
   0x4   :  { %s1261_s11 = smov 0   ;;  %s1263_s12 = smov 0  }
   0x5 LB: > { %s1278_s13 = sadd.s32 4294967295, %s1200_s12   ;;  %s942_s14 = sadd.s32 4294967294, %s1200_s12   ;;  %s1200_s12 = sphi %s1263_s12, %s1519_s12   ;;  %s1196_s11 = sphi %s1261_s11, %s1518_s11   ;;  %s1192_s10 = sphi %s1259_s10, %s1517_s10   ;;  %s1188_s30 = sphi %s1257_s30, %s1516_s30  }
   0x6   : > { %s1282_s15 = sadd.s32 1, %s1200_s12   ;;  %s206_s16 = sadd.s32 1, %s1196_s11 }
   0x7   : > { %s203_s17 = ssub.s32 %s1200_s12, %s1282_s15  ;;  %p216_p0 = scmp.ne.s32.totalorder %s1196_s11, %s1192_s10 }
   0x8   : > { %p204_p1 = scmp.eq.s32.totalorder %s203_s17, 0  ;;  %p217_p2 = scmp.eq.s32.totalorder %s1278_s13, 1 }
   0x9   : > { %p222_p3 = scmp.ne.s32.totalorder %s1192_s10, %s1188_s30  ;;  %p223_p4 = scmp.eq.s32.totalorder %s942_s14, 1 }
   0xa   : > { %s1293_s18 = scalar_select %p204_p1, %s1196_s11, %s206_s16  }
   0xb   : > { %p1295_p5 = por %p217_p2, %p216_p0  ;;  %p1299_p6 = por %p223_p4, %p222_p3 }
   0xc   : > { %p945_p7 = scmp.ge.s32.totalorder %s1200_s12, 1  ;;  %p295_p8 = scmp.lt.s32.totalorder %s1200_s12, 3 }
   0xe   : > { %p296_p9 = pnand %p945_p7, %p295_p8 }
   0xf   : > { %v341_v0 = vld [vmem:[%s1501_s1] sm:$0xff] (!%p296_p9)  ;;  %v1202_v1 = vmov (!%p296_p9), 0   ;;  %v360_v3 = vld [vmem:[%s1503_s3 + $0x18] sm:$0xff] (!%p296_p9)  ;;  %vm425_vm0 = vcmask (!%p296_p9), 64512   ;;  %v362_v5 = vld [vmem:[%s1503_s3 + $0x28] sm:$0xff] (!%p296_p9)  ;;  %p335_p10 = scmp.lt.s32.totalorder (!%p296_p9), %s1278_s13, 1 }
  0x10   : > { %299 = sbr.rel (%p296_p9) target bundleno = 902 (0x386), region = 52  ;;  %1077 = vset.pattern.permute.xlu0 (!%p296_p9), %v1202_v1  ;;  %1078 = vset.pattern.permute.xlu1 (!%p296_p9), %v1202_v1  ;;  %v357_v2 = vld [vmem:[%s1503_s3] sm:$0xff] (!%p296_p9)  ;;  %v364_v6 = vld [vmem:[%s1503_s3 + $0x38] sm:$0xff] (!%p296_p9)  ;;  %v561_v7 = vld [vmem:[%s1505_s5 + $0x8] sm:$0xff] (!%p296_p9)  ;;  %v797_v11 = vsub.f32 (!%p296_p9), 1.0, %v341_v0  ;;  %vm438_vm1 = vcmask (!%p296_p9), 1043456  }
  0x11   : > { %344 = vperm.xlu0 (!%p296_p9), %1077, %v341_v0   ;;  %v1079_v4 = vld [vmem:[%s1502_s2] sm:$0xff] (!%p296_p9)   ;;  %v563_v8 = vld [vmem:[%s1505_s5 + $0x18] sm:$0xff] (!%p296_p9)  ;;  %v565_v9 = vld [vmem:[%s1505_s5 + $0x28] sm:$0xff] (!%p296_p9)  ;;  %vm628_vm2 = vcmask (!%p296_p9), 523264   ;;  %vm1204_vm3 = vmmov (!%p296_p9), 0   ;;  %s1411_s22 = sand.u32 (!%p296_p9), 1, %s1192_s10  }
  0x12   : > { %993 = vmatprep.mubr.msk.bf16.mxu0 (!%p296_p9), %vm425_vm0, %v1079_v4  ;;  %v567_v10 = vld [vmem:[%s1505_s5 + $0x38] sm:$0xff] (!%p296_p9)  ;;  %v737_v12 = vld [vmem:[%s1507_s7 + $0x8] sm:$0xff] (!%p296_p9)  ;;  %v811_v13 = vsub.f32 (!%p296_p9), 0.0, %v797_v11  ;;  %v359_v15 = vld [vmem:[%s1503_s3 + $0x10] sm:$0xff] (!%p296_p9)  ;;  %s1510_s23 = sshll.u32 (!%p296_p9), %s1411_s22, 3  ;;  %s1511_s24 = sshll.u32 (!%p296_p9), %s1278_s13, 7 }
  0x13   : > { %v358_v14 = vld [vmem:[%s1503_s3 + $0x8] sm:$0xff] (!%p296_p9)  ;;  %v361_v16 = vld [vmem:[%s1503_s3 + $0x20] sm:$0xff] (!%p296_p9)  ;;  %v363_v17 = vld [vmem:[%s1503_s3 + $0x30] sm:$0xff] (!%p296_p9)  ;;  %s825_s14 = scalar_lea.sflag (!%p296_p9), [#allocation5], %s1411_s22  ;;  %s1205_s17 = smov (!%p296_p9), [#allocation4]  }
  0x14   : > { %372 = vperm.xlu1 (!%p296_p9), %1078, %v358_v14   ;;  %v560_v18 = vld [vmem:[%s1505_s5] sm:$0xff] (!%p296_p9)  ;;  %v562_v19 = vld [vmem:[%s1505_s5 + $0x10] sm:$0xff] (!%p296_p9)  ;;  %v1080_v28 = vld [vmem:[%s1502_s2 + $0x8] sm:$0xff] (!%p296_p9)   ;;  %s1110_s21 = sshll.u32 (!%p296_p9), %s1205_s17, 4  ;;  %s1111_s21 = int_to_ptr.vmem [resolvable:$false] %s1110_s21 }
  0x15   : > { %367 = vperm.xlu0 (!%p296_p9), %1077, %v357_v2   ;;  %v564_v20 = vld [vmem:[%s1505_s5 + $0x20] sm:$0xff] (!%p296_p9)  ;;  %v566_v21 = vld [vmem:[%s1505_s5 + $0x30] sm:$0xff] (!%p296_p9)  ;;  %v1082_v30 = vld [vmem:[%s1502_s2 + $0x18] sm:$0xff] (!%p296_p9)  }
  0x16   : > { %v736_v22 = vld [vmem:[%s1507_s7] sm:$0xff] (!%p296_p9)  ;;  %v1081_v29 = vld [vmem:[%s1502_s2 + $0x10] sm:$0xff] (!%p296_p9)   ;;  %v1084_v4 = vld [vmem:[%s1504_s4 + $0x8] sm:$0xff] (!%p296_p9)  }
  0x17   : > { %s336_s25 = scalar_select %p335_p10, %s1278_s13, 1  ;;  %v1083_v31 = vld [vmem:[%s1504_s4] sm:$0xff]  }
  0x18   : > { %377 = vperm.xlu1 %1078, %v359_v15   ;;  %1009 = vmatprep.mubr.msk.bf16.mxu1 %vm628_vm2, %v1083_v31 }
  0x19   : > { %382 = vperm.xlu0 %1077, %v360_v3   ;;  %s948_s26 = sshll.u32 %s336_s25, 3  ;;  %s334_s25 = scalar_lea.vmem [#allocation4], %s1510_s23 }
  0x1a   : > { %s338_s29 = scalar_lea.vmem %s1500_s0, %s948_s26  ;;  %s851_s26 = sshll.u32 %s334_s25, 4  ;;  %s1424_s26 = int_to_ptr.vmem [resolvable:$true] %s851_s26 }
  0x1b   : > { %v1371_v23 = vld [vmem:[%s338_s29] sm:$0xff]  ;;  %s1422_s29 = scalar_lea.hbm %s1509_s9, %s1511_s24  ;;  %s1106_s16 = scalar_lea.vmem %s1424_s26, 128 }
  0x1c   : > { %387 = vperm.xlu1 %1078, %v361_v16   ;;  %p1107_p11 = scmp.ne.s32.totalorder %s1424_s26, %s1106_s16  ;;  %s1112_s23 = scalar_lea.vmem %s1111_s21, 256 }
  0x1d   : > { %392 = vperm.xlu0 %1077, %v362_v5   ;;  %v1085_v5 = vld [vmem:[%s1504_s4 + $0x10] sm:$0xff]   ;;  %p1113_p0 = scmp.lt.s32.totalorder %s1424_s26, %s1111_s21  ;;  %p1114_p1 = scmp.lt.s32.totalorder %s1112_s23, %s1106_s16 }
  0x1e   : > { %p1108_p12 = pnand %p1107_p11, %p1295_p5 }
  0x1f   : > { %p1115_p2 = por %p1114_p1, %p1113_p0 }
  0x20   : > { %397 = vperm.xlu1 %1078, %v363_v17   ;;  %p1109_p13 = pneg %p1108_p12 }
  0x21   : > { %402 = vperm.xlu0 %1077, %v364_v6   ;;  %v1086_v6 = vld [vmem:[%s1504_s4 + $0x18] sm:$0xff]  }
  0x22   : > { %p1116_p3 = pnand %p1115_p2, %p1109_p13 }
  0x24   : > { %570 = vperm.xlu1 %1078, %v560_v18  }
  0x25   : > { %575 = vperm.xlu0 %1077, %v561_v7   ;;  %v1203_v7 = vmov 0.0  }
  0x28   : > { %580 = vperm.xlu1 %1078, %v562_v19  }
  0x29   : > { %585 = vperm.xlu0 %1077, %v563_v8  }
  0x2c   : > { %590 = vperm.xlu1 %1078, %v564_v20  }
  0x2d   : > { %595 = vperm.xlu0 %1077, %v565_v9  }
  0x30   : > { %600 = vperm.xlu1 %1078, %v566_v21  }
  0x31   : > { %605 = vperm.xlu0 %1077, %v567_v10  }
  0x34   : > { %740 = vperm.xlu1 %1078, %v736_v22  }
  0x35   : > { %745 = vperm.xlu0 %1077, %v737_v12  }
  0x38   : > { %801 = vperm.xlu1 %1078, %v797_v11  }
  0x39   : > { %814 = vperm.xlu0 %1077, %v811_v13  }
  0x90   : > { %v345_v24 = vpop.permute.xlu0 %344 }
  0x91   : > { %v1374_v25 = vmul.f32 %v345_v24, %v1371_v23 }
  0x93   : > { %v356_v26 = vpack.c.bf16 %v1374_v25, %v1374_v25  ;;  %v373_v32 = vpop.permute.xlu1 %372 }
  0x94   : > { %v368_v33 = vpop.permute.xlu0 %367 }
  0x95   : > { %1029 = vmatprep.subr.msk.bf16.mxu0 %vm438_vm1, %v356_v26  ;;  %v440_v27 = vsel %vm438_vm1, %v356_v26, 0 }
  0x96   : > { %992 = vmatpush3.bf16.msra.mxu0 %v440_v27 }
  0x97   : > { %v378_v34 = vpop.permute.xlu1 %377  ;;  %1017 = vmatprep.subr.bf16.mxu0 %v1203_v7 }
  0x98   : > { %v383_v35 = vpop.permute.xlu0 %382 }
  0x99   : > { %994 = vmatmul.mubr.msk.bf16.vlgmr.msra.gmra.mrb[0].mxu0 %vm425_vm0, %v1080_v28 }
  0x9a   : > { %997 = vmatprep.mubr.msk.bf16.mxu0 %vm425_vm0, %v1081_v29 }
  0x9b   : > { %v388_v39 = vpop.permute.xlu1 %387 }
  0x9c   : > { %v393_v44 = vpop.permute.xlu0 %392 }
  0x9f   : > { %v398_v46 = vpop.permute.xlu1 %397 }
  0xa0   : > { %v403_v50 = vpop.permute.xlu0 %402 }
  0xa1   : > { %998 = vmatmul.mubr.msk.bf16.gmra.mrb[4].mxu0 %vm425_vm0, %v1082_v30 }
  0xa2   : > { %1025 = vmatprep.mubr.msk.bf16.mxu0 %vm1204_vm3, %v1203_v7 }
  0xa3   : > { %v571_v8 = vpop.permute.xlu1 %570 }
  0xa4   : > { %v576_v9 = vpop.permute.xlu0 %575 }
  0xa7   : > { %v581_v10 = vpop.permute.xlu1 %580 }
  0xa8   : > { %v586_v11 = vpop.permute.xlu0 %585 }
  0xab   : > { %v591_v15 = vpop.permute.xlu1 %590 }
  0xac   : > { %v596_v20 = vpop.permute.xlu0 %595 }
  0xaf   : > { %v601_v22 = vpop.permute.xlu1 %600 }
  0xb0   : > { %v606_v28 = vpop.permute.xlu0 %605 }
 0x16c   : > { %v995_v36 = vpop.f32.mrb[0].mxu0 }
 0x16d   : > { %v485_v37 = vadd.f32 %v995_v36, %v378_v34  ;;  %v476_v38 = vpop.f32.mrb[1].mxu0 }
 0x16e   : > { %v477_v40 = vadd.f32 %v476_v38, %v368_v33  ;;  %v996_v41 = vpop.f32.mrb[2].mxu0 }
 0x16f   : > { %1088 = vtanh.f32 %v485_v37  ;;  %v488_v42 = vadd.f32 %v996_v41, %v383_v35  ;;  %v479_v43 = vpop.f32.mrb[3].mxu0 }
 0x170   : > { %1090 = vtanh.f32 %v477_v40  ;;  %v480_v45 = vadd.f32 %v479_v43, %v373_v32 }
 0x171   : > { %1092 = vtanh.f32 %v488_v42 }
 0x172   : > { %1094 = vtanh.f32 %v480_v45 }
 0x174   : > { %v999_v47 = vpop.f32.mrb[4].mxu0 }
 0x175   : > { %v501_v48 = vadd.f32 %v999_v47, %v398_v46  ;;  %v492_v49 = vpop.f32.mrb[5].mxu0  ;;  %v1087_v46 = vld [vmem:[%s1506_s6] sm:$0xff]   ;;  %v746_v47 = vpop.permute.xlu0 %745 }
 0x176   : > { %v493_v51 = vadd.f32 %v492_v49, %v388_v39  ;;  %v1000_v52 = vpop.f32.mrb[6].mxu0 }
 0x177   : > { %v504_v53 = vadd.f32 %v1000_v52, %v403_v50  ;;  %v495_v54 = vpop.f32.mrb[7].mxu0  ;;  %v538_v57 = vmax.f32 %v501_v48, 0.0  ;;  %v741_v48 = vpop.permute.xlu1 %740 }
 0x178   : > { %v496_v55 = vadd.f32 %v495_v54, %v393_v44  ;;  %v536_v60 = vmax.f32 %v493_v51, 0.0 }
 0x179   : > { %v1089_v56 = vpop.eup %1088  ;;  %v539_v58 = vmax.f32 %v504_v53, 0.0  ;;  %v815_v52 = vpop.permute.xlu0 %814 }
 0x17a   : > { %v1091_v59 = vpop.eup %1090  ;;  %v537_v61 = vmax.f32 %v496_v55, 0.0 }
 0x17b   : > { %v1093_v62 = vpop.eup %1092  ;;  %v559_v63 = vpack.c.bf16 %v539_v58, %v538_v57 }
 0x17c   : > { %v1095_v0 = vpop.eup %1094  ;;  %v558_v1 = vpack.c.bf16 %v537_v61, %v536_v60  ;;  %v557_v2 = vpack.c.bf16 %v1093_v62, %v1089_v56 }
 0x17d   : > { %v556_v3 = vpack.c.bf16 %v1095_v0, %v1091_v59 }
 0x17f   : > { %1001 = vmatprep.subr.bf16.mxu1 %v556_v3 }
 0x180   : > { %1002 = vmatpush3.bf16.msra.mxu1 %v556_v3 }
 0x181   : > { %1003 = vmatprep.subr.bf16.mxu1 %v557_v2 }
 0x184   : > { %1004 = vmatpush3.bf16.msra.mxu1 %v557_v2 }
 0x185   : > { %1005 = vmatprep.subr.bf16.mxu1 %v558_v1 }
 0x188   : > { %1006 = vmatpush3.bf16.msra.mxu1 %v558_v1 }
 0x189   : > { %1007 = vmatprep.subr.bf16.mxu1 %v559_v63 }
 0x18c   : > { %1008 = vmatpush3.bf16.msra.mxu1 %v559_v63 }
 0x18f   : > { %1010 = vmatmul.mubr.msk.bf16.vlgmr.msra.gmra.mrb[0].mxu1 %vm628_vm2, %v1084_v4 }
 0x190   : > { %1013 = vmatprep.mubr.msk.bf16.mxu1 %vm628_vm2, %v1085_v5 }
 0x197   : > { %1014 = vmatmul.mubr.msk.bf16.gmra.mrb[4].mxu1 %vm628_vm2, %v1086_v6 }
 0x262   : > { %v1011_v12 = vpop.f32.mrb[0].mxu1 }
 0x263   : > { %v684_v13 = vadd.f32 %v1011_v12, %v581_v10  ;;  %v675_v14 = vpop.f32.mrb[1].mxu1 }
 0x264   : > { %v676_v16 = vadd.f32 %v675_v14, %v571_v8  ;;  %v1012_v17 = vpop.f32.mrb[2].mxu1 }
 0x265   : > { %1096 = vtanh.f32 %v684_v13  ;;  %v687_v18 = vadd.f32 %v1012_v17, %v586_v11  ;;  %v678_v19 = vpop.f32.mrb[3].mxu1 }
 0x266   : > { %1098 = vtanh.f32 %v676_v16  ;;  %v679_v21 = vadd.f32 %v678_v19, %v576_v9 }
 0x267   : > { %1100 = vtanh.f32 %v687_v18 }
 0x268   : > { %1102 = vtanh.f32 %v679_v21 }
 0x26a   : > { %v1015_v24 = vpop.f32.mrb[4].mxu1 }
 0x26b   : > { %v700_v26 = vadd.f32 %v1015_v24, %v601_v22  ;;  %v691_v27 = vpop.f32.mrb[5].mxu1 }
 0x26c   : > { %v692_v29 = vadd.f32 %v691_v27, %v591_v15  ;;  %v1016_v30 = vpop.f32.mrb[6].mxu1 }
 0x26d   : > { %v703_v31 = vadd.f32 %v1016_v30, %v606_v28  ;;  %v694_v32 = vpop.f32.mrb[7].mxu1  ;;  %v720_v35 = vmax.f32 %v700_v26, 0.0 }
 0x26e   : > { %v695_v33 = vadd.f32 %v694_v32, %v596_v20  ;;  %v718_v38 = vmax.f32 %v692_v29, 0.0 }
 0x26f   : > { %v1097_v34 = vpop.eup %1096  ;;  %v721_v36 = vmax.f32 %v703_v31, 0.0 }
 0x270   : > { %v1099_v37 = vpop.eup %1098  ;;  %v719_v39 = vmax.f32 %v695_v33, 0.0 }
 0x271   : > { %v1101_v40 = vpop.eup %1100  ;;  %v735_v41 = vpack.c.bf16 %v721_v36, %v720_v35 }
 0x272   : > { %v1103_v42 = vpop.eup %1102  ;;  %v734_v43 = vpack.c.bf16 %v719_v39, %v718_v38  ;;  %v733_v44 = vpack.c.bf16 %v1101_v40, %v1097_v34 }
 0x273   : > { %v732_v45 = vpack.c.bf16 %v1103_v42, %v1099_v37 }
 0x275   : > { %1018 = vmatpush3.bf16.msra.mxu0 %v732_v45 }
 0x276   : > { %1019 = vmatprep.subr.bf16.mxu0 %v1203_v7 }
 0x279   : > { %1020 = vmatpush3.bf16.msra.mxu0 %v733_v44 }
 0x27a   : > { %1021 = vmatprep.subr.bf16.mxu0 %v1203_v7 }
 0x27d   : > { %1022 = vmatpush3.bf16.msra.mxu0 %v734_v43 }
 0x27e   : > { %1023 = vmatprep.subr.bf16.mxu0 %v1203_v7 }
 0x281   : > { %1024 = vmatpush3.bf16.msra.mxu0 %v735_v41 }
 0x284   : > { %1026 = vmatmul.mubr.msk.bf16.vlgmr.msra.gmra.mrb[8].mxu0 %vm628_vm2, %v1087_v46 }
 0x357   : > { %v790_v49 = vpop.f32.mrb[8].mxu0 }
 0x358   : > { %v791_v50 = vadd.f32 %v790_v49, %v741_v48  ;;  %v1027_v51 = vpop.f32.mrb[9].mxu0 }
 0x359   : > { %v793_v53 = vpop.f32.mrb[10].mxu0 }
 0x35a   : > { %v805_v54 = vsub.f32 0.0, %v791_v50  ;;  %v817_v55 = vmul.f32 %v815_v52, %v791_v50  ;;  %v1028_v56 = vpop.f32.mrb[11].mxu0 }
 0x35c   : > { %v806_v57 = vmul.f32 1.442695, %v805_v54  ;;  %818 = vst [vmem:[%s334_s25] sm:$0xff] %v817_v55 }
 0x35d   : > { %1119 = shalt.err (!%p1116_p3)
}
 0x35e   : > { %s1120_s25 = scalar_lea.hbm %s1422_s29, 128  ;;  %s1124_s17 = scalar_lea.hbm %s1509_s9, 256 }
 0x35f   : > { %p1121_p4 = scmp.ne.s32.totalorder %s1422_s29, %s1120_s25  ;;  %p1125_p9 = scmp.lt.u32.totalorder %s1422_s29, %s1509_s9 }
 0x360   : > { %p1126_p10 = scmp.lt.u32.totalorder %s1124_s17, %s1120_s25  ;;  %p1128_p12 = scmp.lt.u32.totalorder %s1120_s25, %s1422_s29 }
 0x361   : > { %p1122_p7 = pnand %p1121_p4, %p1295_p5 }
 0x362   : > { %p1127_p11 = por %p1126_p10, %p1125_p9 }
 0x363   : > { %p1123_p8 = pneg %p1122_p7 }
 0x364   : > { %p1129_p13 = por %p1128_p12, %p1127_p11 }
 0x366   : > { %p1130_p0 = pnand %p1129_p13, %p1123_p8 }
 0x368   : > { %1133 = shalt.err (!%p1130_p0)
}
 0x369   : > { %1031 = dma.vmem_to_hbm [thread:$0]  (%p1295_p5), %s1424_s26, 128, %s1422_s29, %s825_s14   ;;  %1104 = vpow2.f32 %v806_v57  ;;  %v794_v58 = vadd.f32 %v793_v53, %v746_v47  ;;  %v802_v60 = vpop.permute.xlu1 %801 }
 0x36a   : > { %s1514_s23 = sshll.u32 %s1411_s22, 3  ;;  %s1515_s25 = sshll.u32 %s1278_s13, 7 }
 0x36b   : > { %v798_v59 = vsub.f32 %v1371_v23, %v794_v58  ;;  %s327_s24 = scalar_lea.vmem [#allocation2], %s1514_s23  ;;  %s1457_s17 = scalar_lea.hbm %s1508_s8, %s1515_s25 }
 0x36c   : > { %s838_s16 = sshll.u32 %s327_s24, 4  ;;  %s820_s26 = scalar_lea.sflag [#allocation3], %s1411_s22  ;;  %s1459_s16 = int_to_ptr.vmem [resolvable:$true] %s838_s16 }
 0x36d   : > { %v804_v61 = vmul.f32 %v802_v60, %v798_v59  ;;  %s1134_s29 = scalar_lea.vmem %s1459_s16, 128  ;;  %s1206_s14 = smov [#allocation2]  }
 0x36e   : > { %p1135_p1 = scmp.ne.s32.totalorder %s1459_s16, %s1134_s29  ;;  %s1138_s21 = sshll.u32 %s1206_s14, 4  ;;  %s1139_s21 = int_to_ptr.vmem [resolvable:$false] %s1138_s21 }
 0x36f   : > { %s1140_s13 = scalar_lea.vmem %s1139_s21, 256  ;;  %p1141_p4 = scmp.lt.s32.totalorder %s1459_s16, %s1139_s21 }
 0x370   : > { %p1136_p2 = pnand %p1135_p1, %p1295_p5  ;;  %p1142_p7 = scmp.lt.s32.totalorder %s1140_s13, %s1134_s29 }
 0x372   : > { %p1137_p3 = pneg %p1136_p2  ;;  %p1143_p8 = por %p1142_p7, %p1141_p4 }
 0x373   : > { %v1105_v62 = vpop.eup %1104 }
 0x374   : > { %v808_v63 = vmul.f32 %v1105_v62, %v804_v61  ;;  %p1144_p9 = pnand %p1143_p8, %p1137_p3 }
 0x376   : > { %v809_v0 = vadd.f32 %v808_v63, %v1374_v25 }
 0x378   : > { %810 = vst [vmem:[%s327_s24] sm:$0xff] %v809_v0 }
 0x379   : > { %1147 = shalt.err (!%p1144_p9)
}
 0x37a   : > { %s1148_s22 = scalar_lea.hbm %s1457_s17, 128  ;;  %s1152_s25 = scalar_lea.hbm %s1508_s8, 256 }
 0x37b   : > { %p1149_p10 = scmp.ne.s32.totalorder %s1457_s17, %s1148_s22  ;;  %p1153_p13 = scmp.lt.u32.totalorder %s1457_s17, %s1508_s8 }
 0x37c   : > { %p1154_p0 = scmp.lt.u32.totalorder %s1152_s25, %s1148_s22  ;;  %p1156_p2 = scmp.lt.u32.totalorder %s1148_s22, %s1457_s17 }
 0x37d   : > { %p1150_p11 = pnand %p1149_p10, %p1295_p5 }
 0x37e   : > { %p1155_p1 = por %p1154_p0, %p1153_p13 }
 0x37f   : > { %p1151_p12 = pneg %p1150_p11 }
 0x380   : > { %p1157_p3 = por %p1156_p2, %p1155_p1 }
 0x382   : > { %p1158_p4 = pnand %p1157_p3, %p1151_p12 }
 0x384   : > { %1161 = shalt.err (!%p1158_p4)
}
 0x385   : > { %1030 = dma.vmem_to_hbm [thread:$0]  (%p1295_p5), %s1459_s16, 128, %s1457_s17, %s820_s26  }
 0x386 PF: > { %p1041_p7 = scmp.ge.s32.totalorder %s1200_s12, 2  ;;  %s863_s29 = sand.u32 1, %s1188_s30  }
 0x387   : > { %s864_s14 = scalar_lea.sflag [#allocation3], %s863_s29 }
 0x388   : > { %p1035_p8 = pnand %p1041_p7, %p1299_p6 }
 0x38a   : > { %1179 = dma.done.wait (!%p1035_p8), %s864_s14, 128  }
 0x38b   : > { %1181 = vsyncadd (!%p1035_p8), %s864_s14, 4294967168  ;;  %s873_s21 = scalar_lea.sflag [#allocation5], %s863_s29 }
 0x38c   : > { %1183 = dma.done.wait (!%p1035_p8), %s873_s21, 128  }
 0x38d   : > { %1185 = vsyncadd (!%p1035_p8), %s873_s21, 4294967168  ;;  %p23_p5 = scmp.ge.s32.totalorder %s1282_s15, 4   ;;  %s1516_s30 = smov %s1192_s10 }
 0x38e   : > { %s1517_s10 = smov %s1196_s11  ;;  %s1518_s11 = smov %s1293_s18 }
 0x38f   : > { %s1519_s12 = smov %s1282_s15  ;;  %25 = sbr.rel (!%p23_p5) target bundleno = 5 (0x5), region = 104 }
 0x396   :  { %878 = vsyncpa [#allocation3], 1 }
 0x397   :  { %880 = vsyncpa [#allocation3 + $0x1], 1 }
 0x398   :  { %881 = vsyncpa [#allocation5], 1 }
 0x399   :  { %883 = vsyncpa [#allocation5 + $0x1], 1 }

</bundles_post_ra>
